<compile_context>
chip_gen: v5e
topology: v5e:2x2
jax: 0.10.0
libtpu: 0.0.40
codegen_flags: <defaults>
</compile_context>

<pallas_src>
import functools

import jax
import jax.numpy as jnp
from jax.experimental import pallas as pl
from jax.experimental.pallas import tpu as pltpu


# -----------------------------------------------------------------------------
# Fused kernel: diffusion recursion + 1x1 conv, one batch tile per grid step
# -----------------------------------------------------------------------------
def _fused_prop_kernel(x_ref, at_ref, wk_ref, b_ref, o_ref, *, gdep, alpha):
    """Refs:
      x_ref : (TN, c_in, V, L)      input block (native layout)
      at_ref: (V, V)                a^T  (normalized adjacency, transposed), f32
      wk_ref: (c_out*L, c_in*L)     W ⊗ I_L (1x1-conv weight lifted to working layout), f32
      b_ref : (c_out*L, 1)          bias repeated per L (lane-broadcast add), f32
      o_ref : (TN, c_out, V, L)     output block (native layout)
    """
    tn, c_in, V, L = x_ref.shape
    c_out = o_ref.shape[1]

    # Resident operands (index maps are constant -> fetched once for the grid).
    a_t = at_ref[...]
    w_k = wk_ref[...]
    b_r = b_ref[...]

    for n in range(tn):
        # Re-lay this batch element out as (c_in*L, V): node axis on lanes so all
        # matmuls below are lane-wide on the MXU.
        xt = jnp.concatenate(
            [x_ref[n, c].astype(jnp.float32).T for c in range(c_in)], axis=0)

        # gdep-step diffusion entirely in VMEM:
        #   h <- alpha*x + (1-alpha) * (a @ h)   (node contraction)
        # expressed in the transposed layout as ht <- alpha*xt + (1-alpha)*(ht @ a^T).
        ht = xt
        for _ in range(gdep):
            ht = alpha * xt + (1.0 - alpha) * jnp.dot(
                ht, a_t, preferred_element_type=jnp.float32)

        # Fused 1x1 conv (channel mixing) as one wide matmul with W ⊗ I_L; the
        # bias is a lane-broadcast add (no scalar loads needed).
        ot = jnp.dot(w_k, ht, preferred_element_type=jnp.float32) + b_r   # (c_out*L, V)

        # Back to the native (V, L) tile per output channel and store.
        for o in range(c_out):
            o_ref[n, o] = ot[o * L:(o + 1) * L, :].T.astype(o_ref.dtype)


# -----------------------------------------------------------------------------
# Generation-aware VMEM budget + batch-tile selection
# -----------------------------------------------------------------------------
def _vmem_limit_bytes():
    cap = 64 * 1024 * 1024                      # conservative (v7x physical) fallback
    try:
        cap = int(pltpu.get_tpu_info().vmem_capacity_bytes)
    except Exception:                           # pragma: no cover - defensive
        pass
    # Leave headroom for double-buffering bookkeeping and compiler temporaries.
    return max(16 * 1024 * 1024, min((cap * 3) // 4, 112 * 1024 * 1024))


def _largest_divisor_at_most(n, cap):
    cap = max(1, min(n, cap))
    for t in range(cap, 0, -1):
        if n % t == 0:
            return t
    return 1


def _pick_batch_tile(n, c_in, c_out, v, l, vmem_budget):
    itm = 4                                               # f32 working precision
    per_n_io = (c_in + c_out) * v * l * itm               # x block + out block / batch elem
    per_n_work = 4 * c_in * l * v * itm                   # xt, ht, matmul temps (values)
    fixed = v * v * itm + (c_out * l) * (c_in * l) * itm + c_out * l * itm
    avail = max(vmem_budget // 2 - fixed, per_n_io)
    cap = max(1, avail // (2 * per_n_io + per_n_work))    # x/out double-buffered
    cap = min(cap, 4)                                      # bound static unroll / code size
    if n >= 2:
        cap = min(cap, n // 2)                             # keep >= 2 parallel grid steps (v7x)
    return _largest_divisor_at_most(n, max(cap, 1))


# -----------------------------------------------------------------------------
# Wrapper: full Prop forward
# -----------------------------------------------------------------------------
def prop_forward(x, adj, weight, bias, *, gdep, alpha):
    """MTGNN Prop forward.

    x      : (N, c_in, V, L)
    adj    : (V, V) un-normalized adjacency (no self loops)
    weight : (c_out, c_in)   -- squeezed Conv2d (c_out, c_in, 1, 1) weight
    bias   : (c_out,)
    returns: (N, c_out, V, L)
    """
    N, C, V, L = x.shape
    c_out = weight.shape[0]
    f32 = jnp.float32

    # Hoisted adjacency normalization (O(V^2), computed once, not per grid step).
    adj_i = adj.astype(f32) + jnp.eye(V, dtype=f32)
    a = adj_i / jnp.sum(adj_i, axis=1, keepdims=True)
    a_t = a.T                                                     # ht @ a^T == nconv(h, a)

    # 1x1-conv weight lifted to the (C*L, V) working layout, bias repeated per L.
    w_kron = jnp.kron(weight.astype(f32), jnp.eye(L, dtype=f32))  # (c_out*L, C*L)
    b_rep = jnp.repeat(bias.astype(f32), L).reshape(c_out * L, 1)

    vmem_limit = _vmem_limit_bytes()
    tn = _pick_batch_tile(N, C, c_out, V, L, vmem_limit)

    kernel = functools.partial(_fused_prop_kernel, gdep=gdep, alpha=alpha)
    out = pl.pallas_call(
        kernel,
        out_shape=jax.ShapeDtypeStruct((N, c_out, V, L), x.dtype),
        grid_spec=pltpu.PrefetchScalarGridSpec(
            num_scalar_prefetch=0,
            grid=(N // tn,),
            in_specs=[
                pl.BlockSpec((tn, C, V, L), lambda i: (i, 0, 0, 0)),
                pl.BlockSpec((V, V), lambda i: (0, 0)),
                pl.BlockSpec((c_out * L, C * L), lambda i: (0, 0)),
                pl.BlockSpec((c_out * L, 1), lambda i: (0, 0)),
            ],
            out_specs=pl.BlockSpec((tn, c_out, V, L), lambda i: (i, 0, 0, 0)),
        ),
        compiler_params=pltpu.CompilerParams(
            dimension_semantics=("parallel",),
            vmem_limit_bytes=int(vmem_limit)),
    )(x, a_t, w_kron, b_rep)
    return out


if __name__ == "__main__":
    key = jax.random.PRNGKey(0)
    k_x, k_adj, k_w, k_b = jax.random.split(key, 4)

    # Small shapes consistent with Prop.forward: x is (batch, c_in, nodes, seq).
    N, c_in, c_out, V, L = 2, 4, 8, 16, 12
    gdep, alpha = 2, 0.05                      # dropout attr is unused in forward

    x = jax.random.normal(k_x, (N, c_in, V, L), dtype=jnp.float32)
    adj = jax.random.uniform(k_adj, (V, V), dtype=jnp.float32)
    bound = 1.0 / (c_in ** 0.5)
    weight = jax.random.uniform(k_w, (c_out, c_in), jnp.float32, -bound, bound)
    bias = jax.random.uniform(k_b, (c_out,), jnp.float32, -bound, bound)

    out = prop_forward(x, adj, weight, bias, gdep=gdep, alpha=alpha)
    out = jax.block_until_ready(out)

    # Plain-JAX reference of the PyTorch Prop.forward.
    adj_i = adj + jnp.eye(V, dtype=adj.dtype)
    a = adj_i / adj_i.sum(axis=1, keepdims=True)
    h_ref = x
    for _ in range(gdep):
        h_ref = alpha * x + (1.0 - alpha) * jnp.einsum("ncwl,vw->ncvl", h_ref, a)
    ref = jnp.einsum("ncvl,oc->novl", h_ref, weight) + bias[None, :, None, None]

    assert out.shape == (N, c_out, V, L)
    err = float(jnp.max(jnp.abs(out - ref)))
    assert err < 2e-3, f"max abs err {err}"

    print("KERNEL_OK")
</pallas_src>

<mosaic_0001>
module attributes {stable_mosaic.version = 11 : i64} {
  func.func @_fused_prop_kernel(%arg0: i32, %arg1: memref<1x4x16x12xf32, #tpu.memory_space<vmem>>, %arg2: memref<16x16xf32, #tpu.memory_space<vmem>>, %arg3: memref<96x48xf32, #tpu.memory_space<vmem>>, %arg4: memref<96x1xf32, #tpu.memory_space<vmem>>, %arg5: memref<1x8x16x12xf32, #tpu.memory_space<vmem>>) attributes {dimension_semantics = [#tpu.dimension_semantics<parallel>], iteration_bounds = array<i64: 2>, scalar_prefetch = 0 : i64, scratch_operands = 0 : i64, tpu.core_type = #tpu.core_type<tc>, window_params = [{transform_indices = @transform_0, window_bounds = array<i64: 1, 4, 16, 12>}, {pipeline_mode = #tpu.pipeline_mode<synchronous>, transform_indices = @transform_1, window_bounds = array<i64: 16, 16>}, {pipeline_mode = #tpu.pipeline_mode<synchronous>, transform_indices = @transform_2, window_bounds = array<i64: 96, 48>}, {pipeline_mode = #tpu.pipeline_mode<synchronous>, transform_indices = @transform_3, window_bounds = array<i64: 96, 1>}, {transform_indices = @transform_4, window_bounds = array<i64: 1, 8, 16, 12>}]} {
    %c0 = arith.constant 0 : index
    %c0_0 = arith.constant 0 : index
    %0 = vector.load %arg2[%c0, %c0_0] : memref<16x16xf32, #tpu.memory_space<vmem>>, vector<16x16xf32>
    %c0_1 = arith.constant 0 : index
    %c0_2 = arith.constant 0 : index
    %1 = vector.load %arg3[%c0_1, %c0_2] : memref<96x48xf32, #tpu.memory_space<vmem>>, vector<96x48xf32>
    %c0_3 = arith.constant 0 : index
    %c0_4 = arith.constant 0 : index
    %2 = vector.load %arg4[%c0_3, %c0_4] : memref<96x1xf32, #tpu.memory_space<vmem>>, vector<96x1xf32>
    %c0_5 = arith.constant 0 : index
    %c0_6 = arith.constant 0 : index
    %c0_7 = arith.constant 0 : index
    %c0_8 = arith.constant 0 : index
    %3 = vector.load %arg1[%c0_5, %c0_6, %c0_7, %c0_8] : memref<1x4x16x12xf32, #tpu.memory_space<vmem>>, vector<1x1x16x12xf32>
    %4 = vector.shape_cast %3 : vector<1x1x16x12xf32> to vector<16x12xf32>
    %5 = tpu.transpose %4, [1, 0] : vector<16x12xf32> -> vector<12x16xf32>
    %c0_9 = arith.constant 0 : index
    %c1 = arith.constant 1 : index
    %c0_10 = arith.constant 0 : index
    %c0_11 = arith.constant 0 : index
    %6 = vector.load %arg1[%c0_9, %c1, %c0_10, %c0_11] : memref<1x4x16x12xf32, #tpu.memory_space<vmem>>, vector<1x1x16x12xf32>
    %7 = vector.shape_cast %6 : vector<1x1x16x12xf32> to vector<16x12xf32>
    %8 = tpu.transpose %7, [1, 0] : vector<16x12xf32> -> vector<12x16xf32>
    %c0_12 = arith.constant 0 : index
    %c2 = arith.constant 2 : index
    %c0_13 = arith.constant 0 : index
    %c0_14 = arith.constant 0 : index
    %9 = vector.load %arg1[%c0_12, %c2, %c0_13, %c0_14] : memref<1x4x16x12xf32, #tpu.memory_space<vmem>>, vector<1x1x16x12xf32>
    %10 = vector.shape_cast %9 : vector<1x1x16x12xf32> to vector<16x12xf32>
    %11 = tpu.transpose %10, [1, 0] : vector<16x12xf32> -> vector<12x16xf32>
    %c0_15 = arith.constant 0 : index
    %c3 = arith.constant 3 : index
    %c0_16 = arith.constant 0 : index
    %c0_17 = arith.constant 0 : index
    %12 = vector.load %arg1[%c0_15, %c3, %c0_16, %c0_17] : memref<1x4x16x12xf32, #tpu.memory_space<vmem>>, vector<1x1x16x12xf32>
    %13 = vector.shape_cast %12 : vector<1x1x16x12xf32> to vector<16x12xf32>
    %14 = tpu.transpose %13, [1, 0] : vector<16x12xf32> -> vector<12x16xf32>
    %15 = tpu.concatenate %5, %8, %11, %14 in 0 : vector<12x16xf32>, vector<12x16xf32>, vector<12x16xf32>, vector<12x16xf32> -> vector<48x16xf32>
    %cst = arith.constant 5.000000e-02 : f32
    %16 = vector.broadcast %cst : f32 to vector<48x16xf32>
    %17 = arith.mulf %16, %15 : vector<48x16xf32>
    %cst_18 = arith.constant dense<0.000000e+00> : vector<48x16xf32>
    %18 = tpu.matmul %15, %0, %cst_18 {dimension_numbers = #tpu.dot_dimension_numbers<[1], [0], [0], [1], [0, 0, 1, 1], [], []>} : vector<48x16xf32>, vector<16x16xf32>, vector<48x16xf32> -> vector<48x16xf32>
    %cst_19 = arith.constant 0.949999988 : f32
    %19 = vector.broadcast %cst_19 : f32 to vector<48x16xf32>
    %20 = arith.mulf %19, %18 : vector<48x16xf32>
    %21 = arith.addf %17, %20 : vector<48x16xf32>
    %cst_20 = arith.constant 5.000000e-02 : f32
    %22 = vector.broadcast %cst_20 : f32 to vector<48x16xf32>
    %23 = arith.mulf %22, %15 : vector<48x16xf32>
    %cst_21 = arith.constant dense<0.000000e+00> : vector<48x16xf32>
    %24 = tpu.matmul %21, %0, %cst_21 {dimension_numbers = #tpu.dot_dimension_numbers<[1], [0], [0], [1], [0, 0, 1, 1], [], []>} : vector<48x16xf32>, vector<16x16xf32>, vector<48x16xf32> -> vector<48x16xf32>
    %cst_22 = arith.constant 0.949999988 : f32
    %25 = vector.broadcast %cst_22 : f32 to vector<48x16xf32>
    %26 = arith.mulf %25, %24 : vector<48x16xf32>
    %27 = arith.addf %23, %26 : vector<48x16xf32>
    %cst_23 = arith.constant dense<0.000000e+00> : vector<96x16xf32>
    %28 = tpu.matmul %1, %27, %cst_23 {dimension_numbers = #tpu.dot_dimension_numbers<[1], [0], [0], [1], [0, 0, 1, 1], [], []>} : vector<96x48xf32>, vector<48x16xf32>, vector<96x16xf32> -> vector<96x16xf32>
    %29 = vector.broadcast %2 : vector<96x1xf32> to vector<96x16xf32>
    %30 = arith.addf %28, %29 : vector<96x16xf32>
    %31 = vector.extract_strided_slice %30 {offsets = [0, 0], sizes = [12, 16], strides = [1, 1]} : vector<96x16xf32> to vector<12x16xf32>
    %32 = tpu.transpose %31, [1, 0] : vector<12x16xf32> -> vector<16x12xf32>
    %c0_24 = arith.constant 0 : index
    %c0_25 = arith.constant 0 : index
    %c0_26 = arith.constant 0 : index
    %c0_27 = arith.constant 0 : index
    %33 = vector.load %arg5[%c0_24, %c0_25, %c0_26, %c0_27] : memref<1x8x16x12xf32, #tpu.memory_space<vmem>>, vector<1x1x16x12xf32>
    %34 = vector.shape_cast %33 : vector<1x1x16x12xf32> to vector<16x12xf32>
    %35 = vector.shape_cast %32 : vector<16x12xf32> to vector<1x1x16x12xf32>
    tpu.vector_store %arg5[%c0_24, %c0_25, %c0_26, %c0_27], %35 {strides = array<i32>} : memref<1x8x16x12xf32, #tpu.memory_space<vmem>>, vector<1x1x16x12xf32>,
    %36 = vector.extract_strided_slice %30 {offsets = [12, 0], sizes = [12, 16], strides = [1, 1]} : vector<96x16xf32> to vector<12x16xf32>
    %37 = tpu.transpose %36, [1, 0] : vector<12x16xf32> -> vector<16x12xf32>
    %c0_28 = arith.constant 0 : index
    %c1_29 = arith.constant 1 : index
    %c0_30 = arith.constant 0 : index
    %c0_31 = arith.constant 0 : index
    %38 = vector.load %arg5[%c0_28, %c1_29, %c0_30, %c0_31] : memref<1x8x16x12xf32, #tpu.memory_space<vmem>>, vector<1x1x16x12xf32>
    %39 = vector.shape_cast %38 : vector<1x1x16x12xf32> to vector<16x12xf32>
    %40 = vector.shape_cast %37 : vector<16x12xf32> to vector<1x1x16x12xf32>
    tpu.vector_store %arg5[%c0_28, %c1_29, %c0_30, %c0_31], %40 {strides = array<i32>} : memref<1x8x16x12xf32, #tpu.memory_space<vmem>>, vector<1x1x16x12xf32>,
    %41 = vector.extract_strided_slice %30 {offsets = [24, 0], sizes = [12, 16], strides = [1, 1]} : vector<96x16xf32> to vector<12x16xf32>
    %42 = tpu.transpose %41, [1, 0] : vector<12x16xf32> -> vector<16x12xf32>
    %c0_32 = arith.constant 0 : index
    %c2_33 = arith.constant 2 : index
    %c0_34 = arith.constant 0 : index
    %c0_35 = arith.constant 0 : index
    %43 = vector.load %arg5[%c0_32, %c2_33, %c0_34, %c0_35] : memref<1x8x16x12xf32, #tpu.memory_space<vmem>>, vector<1x1x16x12xf32>
    %44 = vector.shape_cast %43 : vector<1x1x16x12xf32> to vector<16x12xf32>
    %45 = vector.shape_cast %42 : vector<16x12xf32> to vector<1x1x16x12xf32>
    tpu.vector_store %arg5[%c0_32, %c2_33, %c0_34, %c0_35], %45 {strides = array<i32>} : memref<1x8x16x12xf32, #tpu.memory_space<vmem>>, vector<1x1x16x12xf32>,
    %46 = vector.extract_strided_slice %30 {offsets = [36, 0], sizes = [12, 16], strides = [1, 1]} : vector<96x16xf32> to vector<12x16xf32>
    %47 = tpu.transpose %46, [1, 0] : vector<12x16xf32> -> vector<16x12xf32>
    %c0_36 = arith.constant 0 : index
    %c3_37 = arith.constant 3 : index
    %c0_38 = arith.constant 0 : index
    %c0_39 = arith.constant 0 : index
    %48 = vector.load %arg5[%c0_36, %c3_37, %c0_38, %c0_39] : memref<1x8x16x12xf32, #tpu.memory_space<vmem>>, vector<1x1x16x12xf32>
    %49 = vector.shape_cast %48 : vector<1x1x16x12xf32> to vector<16x12xf32>
    %50 = vector.shape_cast %47 : vector<16x12xf32> to vector<1x1x16x12xf32>
    tpu.vector_store %arg5[%c0_36, %c3_37, %c0_38, %c0_39], %50 {strides = array<i32>} : memref<1x8x16x12xf32, #tpu.memory_space<vmem>>, vector<1x1x16x12xf32>,
    %51 = vector.extract_strided_slice %30 {offsets = [48, 0], sizes = [12, 16], strides = [1, 1]} : vector<96x16xf32> to vector<12x16xf32>
    %52 = tpu.transpose %51, [1, 0] : vector<12x16xf32> -> vector<16x12xf32>
    %c0_40 = arith.constant 0 : index
    %c4 = arith.constant 4 : index
    %c0_41 = arith.constant 0 : index
    %c0_42 = arith.constant 0 : index
    %53 = vector.load %arg5[%c0_40, %c4, %c0_41, %c0_42] : memref<1x8x16x12xf32, #tpu.memory_space<vmem>>, vector<1x1x16x12xf32>
    %54 = vector.shape_cast %53 : vector<1x1x16x12xf32> to vector<16x12xf32>
    %55 = vector.shape_cast %52 : vector<16x12xf32> to vector<1x1x16x12xf32>
    tpu.vector_store %arg5[%c0_40, %c4, %c0_41, %c0_42], %55 {strides = array<i32>} : memref<1x8x16x12xf32, #tpu.memory_space<vmem>>, vector<1x1x16x12xf32>,
    %56 = vector.extract_strided_slice %30 {offsets = [60, 0], sizes = [12, 16], strides = [1, 1]} : vector<96x16xf32> to vector<12x16xf32>
    %57 = tpu.transpose %56, [1, 0] : vector<12x16xf32> -> vector<16x12xf32>
    %c0_43 = arith.constant 0 : index
    %c5 = arith.constant 5 : index
    %c0_44 = arith.constant 0 : index
    %c0_45 = arith.constant 0 : index
    %58 = vector.load %arg5[%c0_43, %c5, %c0_44, %c0_45] : memref<1x8x16x12xf32, #tpu.memory_space<vmem>>, vector<1x1x16x12xf32>
    %59 = vector.shape_cast %58 : vector<1x1x16x12xf32> to vector<16x12xf32>
    %60 = vector.shape_cast %57 : vector<16x12xf32> to vector<1x1x16x12xf32>
    tpu.vector_store %arg5[%c0_43, %c5, %c0_44, %c0_45], %60 {strides = array<i32>} : memref<1x8x16x12xf32, #tpu.memory_space<vmem>>, vector<1x1x16x12xf32>,
    %61 = vector.extract_strided_slice %30 {offsets = [72, 0], sizes = [12, 16], strides = [1, 1]} : vector<96x16xf32> to vector<12x16xf32>
    %62 = tpu.transpose %61, [1, 0] : vector<12x16xf32> -> vector<16x12xf32>
    %c0_46 = arith.constant 0 : index
    %c6 = arith.constant 6 : index
    %c0_47 = arith.constant 0 : index
    %c0_48 = arith.constant 0 : index
    %63 = vector.load %arg5[%c0_46, %c6, %c0_47, %c0_48] : memref<1x8x16x12xf32, #tpu.memory_space<vmem>>, vector<1x1x16x12xf32>
    %64 = vector.shape_cast %63 : vector<1x1x16x12xf32> to vector<16x12xf32>
    %65 = vector.shape_cast %62 : vector<16x12xf32> to vector<1x1x16x12xf32>
    tpu.vector_store %arg5[%c0_46, %c6, %c0_47, %c0_48], %65 {strides = array<i32>} : memref<1x8x16x12xf32, #tpu.memory_space<vmem>>, vector<1x1x16x12xf32>,
    %66 = vector.extract_strided_slice %30 {offsets = [84, 0], sizes = [12, 16], strides = [1, 1]} : vector<96x16xf32> to vector<12x16xf32>
    %67 = tpu.transpose %66, [1, 0] : vector<12x16xf32> -> vector<16x12xf32>
    %c0_49 = arith.constant 0 : index
    %c7 = arith.constant 7 : index
    %c0_50 = arith.constant 0 : index
    %c0_51 = arith.constant 0 : index
    %68 = vector.load %arg5[%c0_49, %c7, %c0_50, %c0_51] : memref<1x8x16x12xf32, #tpu.memory_space<vmem>>, vector<1x1x16x12xf32>
    %69 = vector.shape_cast %68 : vector<1x1x16x12xf32> to vector<16x12xf32>
    %70 = vector.shape_cast %67 : vector<16x12xf32> to vector<1x1x16x12xf32>
    tpu.vector_store %arg5[%c0_49, %c7, %c0_50, %c0_51], %70 {strides = array<i32>} : memref<1x8x16x12xf32, #tpu.memory_space<vmem>>, vector<1x1x16x12xf32>,
    return
  }
  func.func @transform_0(%arg0: i32) -> (i32, i32, i32, i32) {
    %c0_i32 = arith.constant 0 : i32
    %c0_i32_0 = arith.constant 0 : i32
    %c0_i32_1 = arith.constant 0 : i32
    %c0_i32_2 = arith.constant 0 : i32
    return %arg0, %c0_i32, %c0_i32_0, %c0_i32_1 : i32, i32, i32, i32
  }
  func.func @transform_1(%arg0: i32) -> (i32, i32) {
    %c0_i32 = arith.constant 0 : i32
    %c0_i32_0 = arith.constant 0 : i32
    %c0_i32_1 = arith.constant 0 : i32
    return %c0_i32, %c0_i32_0 : i32, i32
  }
  func.func @transform_2(%arg0: i32) -> (i32, i32) {
    %c0_i32 = arith.constant 0 : i32
    %c0_i32_0 = arith.constant 0 : i32
    %c0_i32_1 = arith.constant 0 : i32
    return %c0_i32, %c0_i32_0 : i32, i32
  }
  func.func @transform_3(%arg0: i32) -> (i32, i32) {
    %c0_i32 = arith.constant 0 : i32
    %c0_i32_0 = arith.constant 0 : i32
    %c0_i32_1 = arith.constant 0 : i32
    return %c0_i32, %c0_i32_0 : i32, i32
  }
  func.func @transform_4(%arg0: i32) -> (i32, i32, i32, i32) {
    %c0_i32 = arith.constant 0 : i32
    %c0_i32_0 = arith.constant 0 : i32
    %c0_i32_1 = arith.constant 0 : i32
    %c0_i32_2 = arith.constant 0 : i32
    return %arg0, %c0_i32, %c0_i32_0, %c0_i32_1 : i32, i32, i32, i32
  }
}

</mosaic_0001>

<bundles_post_ra>
// kernel: tpu_custom_call.1
= control target key start
LH: loop header
LB: loop body
LE: loop exit
PB: predicated region body
PF: predicated region fallthrough
CT: control target
= control target key end

     0   :  { %s1138_s15 = smov 0   ;;  %s1311_s0 = inlined_call_operand.vmem [shape: f32[2,4,16,12], index: 0, kind: input, shape index: {}]   ;;  %s1312_s1 = inlined_call_operand.vmem [shape: f32[16,16], index: 1, kind: input, shape index: {}]   ;;  %s1313_s2 = inlined_call_operand.vmem [shape: f32[96,48], index: 2, kind: input, shape index: {}]   ;;  %s1314_s3 = inlined_call_operand.vmem [shape: f32[96,1], index: 3, kind: input, shape index: {}]   ;;  %s1315_s4 = inlined_call_operand.vmem [shape: f32[2,8,16,12], index: 4, kind: output, shape index: {}]  }
   0x1 LB: > { %s1028_s16 = sadd.s32 4294967295, %s1110_s15   ;;  %p1032_p0 = scmp.ge.s32.totalorder %s1110_s15, 1  ;;  %s1110_s15 = sphi %s1138_s15, %s14_s15  }
   0x2   : > { %p162_p1 = scmp.lt.s32.totalorder %s1110_s15, 3 }
   0x4   : > { %p163_p2 = pnand %p1032_p0, %p162_p1 }
   0x5   : > { %p188_p3 = scmp.lt.s32.totalorder (!%p163_p2), %s1028_s16, 1 }
   0x6   : > { %166 = sbr.rel (%p163_p2) target bundleno = 848 (0x350), region = 36 }
   0xb   : > { %v199_v0 = vld [vmem:[%s1312_s1 + $0x8] sm:$0xff]  ;;  %v198_v1 = vld [vmem:[%s1312_s1] sm:$0xff]  ;;  %s1317_s16 = smov (!%p188_p3, %s1028_s16), 1  ;;  %vm386_vm0 = vcmask 130048   ;;  %vm365_vm1 = vcmask 1043456   ;;  %v1112_v50 = vmov 0  }
   0xc   : > { %417 = vmatpush.msra.mxu0 %v199_v0  ;;  %482 = vmatpush.msra.mxu1 %v199_v0  ;;  %s1083_s21 = sshll.u32 %s1317_s16, 6  ;;  %v212_v51 = vld [vmem:[%s1314_s3] sm:$0xff]  ;;  %v215_v53 = vld [vmem:[%s1314_s3 + $0x18] sm:$0xff]  ;;  %v218_v56 = vld [vmem:[%s1314_s3 + $0x30] sm:$0xff]  ;;  %vm575_vm2 = vcmask 392192   ;;  %s1084_s25 = sshll.u32 %s1317_s16, 7 }
   0xd   : > { %s192_s24 = scalar_lea.vmem %s1311_s0, %s1083_s21  ;;  %v216_v55 = vld [vmem:[%s1314_s3 + $0x20] sm:$0xff]  ;;  %v222_v61 = vld [vmem:[%s1314_s3 + $0x50] sm:$0xff]  ;;  %s1274_s28 = scalar_lea.vmem %s1315_s4, %s1084_s25  ;;  %vm697_vm3 = vcmask 97280  }
   0xe   : > { %418 = vmatpush.msra.mxu0 %v198_v1  ;;  %483 = vmatpush.msra.mxu1 %v198_v1  ;;  %v1037_v2 = vld [vmem:[%s192_s24 + $0x10] sm:$0xff]  ;;  %v224_v3 = vld [vmem:[%s192_s24] sm:$0xff]  ;;  %v1038_v5 = vld [vmem:[%s192_s24 + $0x18] sm:$0xff] }
   0xf   : > { %261 = vxpose.xlu1.b32.start [1/2] (short) (narrow) %v1037_v2, 16  ;;  %226 = vxpose.xlu0.b32.start [1/2] (short) (narrow) %v224_v3, 16  ;;  %v1039_v4 = vld [vmem:[%s192_s24 + $0x20] sm:$0xff]  ;;  %v225_v6 = vld [vmem:[%s192_s24 + $0x8] sm:$0xff]  ;;  %v1041_v8 = vld [vmem:[%s192_s24 + $0x30] sm:$0xff] }
  0x10   : > { %296 = vxpose.xlu2.b32.start [1/2] (short) (narrow) %v1039_v4, 16  ;;  %v1040_v7 = vld [vmem:[%s192_s24 + $0x28] sm:$0xff]  ;;  %v1042_v9 = vld [vmem:[%s192_s24 + $0x38] sm:$0xff]  ;;  %v220_v59 = vld [vmem:[%s1314_s3 + $0x40] sm:$0xff] }
  0x17   : > { %262 = vxpose.xlu1.b32.end [2/2] (short) (narrow) %v1038_v5, 16  ;;  %227 = vxpose.xlu0.b32.end [2/2] (short) (narrow) %v225_v6, 16 }
  0x18   : > { %297 = vxpose.xlu2.b32.end [2/2] (short) (narrow) %v1040_v7, 16  ;;  %v213_v7 = vld [vmem:[%s1314_s3 + $0x8] sm:$0xff] }
  0x1f   : > { %331 = vxpose.xlu0.b32.start [1/2] (short) (narrow) %v1041_v8, 16 }
  0x27   : > { %332 = vxpose.xlu0.b32.end [2/2] (short) (narrow) %v1042_v9, 16 }
  0x6a   : > { %1101 = vset.pattern.permute.xlu1 %v1112_v50 }
  0x71   : > { %517 = vperm.xlu1 %1101, %v212_v51  }
  0x79   : > { %532 = vperm.xlu1 %1101, %v215_v53  }
  0x7a   : > { %1102 = vset.pattern.permute.xlu2 %v1112_v50 }
  0x81   : > { %537 = vperm.xlu1 %1101, %v216_v55   ;;  %522 = vperm.xlu2 %1102, %v213_v7  }
  0x89   : > { %547 = vperm.xlu1 %1101, %v218_v56  }
  0x8e   : > { %1103 = vset.pattern.permute.xlu0 %v1112_v50 }
  0x91   : > { %557 = vperm.xlu1 %1101, %v220_v59  }
  0x99   : > { %567 = vperm.xlu1 %1101, %v222_v61  }
  0xa9   : > { %v312_v18 = vpop.trf.xlu2 }
  0xaa   : > { %v383_v39 = vmul.f32 0.05, %v312_v18 }
  0xb1   : > { %v313_v21 = vpop.trf.xlu2 }
  0xb3   : > { %v277_v10 = vpop.trf.xlu1  ;;  %v242_v11 = vpop.trf.xlu0 }
  0xb4   : > { %1043 = vmatmul.msk.f32.vlgmr.msra.gmra.mxu0 %vm386_vm0, %v242_v11  ;;  %v366_v12 = vrot.slane %v277_v10, 4  ;;  %v1168_v27 = vmul.f32 0.05, %v242_v11 }
  0xbb   : > { %v243_v13 = vpop.trf.xlu0  ;;  %v278_v15 = vpop.trf.xlu1 }
  0xbc   : > { %v378_v14 = vsel %vm365_vm1, %v243_v13, %v366_v12  ;;  %v367_v16 = vrot.slane %v278_v15, 4  ;;  %v206_v13 = vld [vmem:[%s1313_s2 + $0x30] sm:$0xff] }
  0xbd   : > { %1044 = vmatmul.msk.f32.gmra.mxu0 %vm386_vm0, %v378_v14  ;;  %v1172_v31 = vmul.f32 0.05, %v378_v14  ;;  %v217_v14 = vld [vmem:[%s1314_s3 + $0x28] sm:$0xff]  ;;  %v214_v15 = vld [vmem:[%s1314_s3 + $0x10] sm:$0xff] }
  0xbe   : > { %v368_v17 = vsel %vm365_vm1, %v366_v12, %v367_v16  ;;  %v200_v12 = vld [vmem:[%s1313_s2] sm:$0xff]  ;;  %527 = vperm.xlu0 %1103, %v214_v15   ;;  %542 = vperm.xlu2 %1102, %v217_v14   ;;  %v201_v16 = vld [vmem:[%s1313_s2 + $0x8] sm:$0xff] }
  0xbf   : > { %v382_v35 = vmul.f32 0.05, %v368_v17 }
  0xc3   : > { %v347_v19 = vpop.trf.xlu0 }
  0xc4   : > { %v373_v20 = vrot.slane %v347_v19, 4  ;;  %v223_v19 = vld [vmem:[%s1314_s3 + $0x58] sm:$0xff] }
  0xc5   : > { %1045 = vmatmul.msk.f32.gmra.mxu0 %vm386_vm0, %v368_v17  ;;  %v207_v17 = vld [vmem:[%s1313_s2 + $0x38] sm:$0xff] }
  0xc6   : > { %v379_v22 = vsel %vm365_vm1, %v313_v21, %v373_v20  ;;  %572 = vperm.xlu0 %1103, %v223_v19   ;;  %v208_v21 = vld [vmem:[%s1313_s2 + $0x40] sm:$0xff] }
  0xc7   : > { %v384_v43 = vmul.f32 0.05, %v379_v22 }
  0xcb   : > { %v348_v23 = vpop.trf.xlu0 }
  0xcc   : > { %v374_v24 = vrot.slane %v348_v23, 4  ;;  %v203_v23 = vld [vmem:[%s1313_s2 + $0x18] sm:$0xff] }
  0xcd   : > { %1046 = vmatmul.msk.f32.gmra.mxu0 %vm386_vm0, %v312_v18  ;;  %v219_v18 = vld [vmem:[%s1314_s3 + $0x38] sm:$0xff] }
  0xce   : > { %v375_v25 = vsel %vm365_vm1, %v373_v20, %v374_v24  ;;  %552 = vperm.xlu2 %1102, %v219_v18   ;;  %v202_v20 = vld [vmem:[%s1313_s2 + $0x10] sm:$0xff]  ;;  %v209_v24 = vld [vmem:[%s1313_s2 + $0x48] sm:$0xff] }
  0xcf   : > { %v385_v47 = vmul.f32 0.05, %v375_v25 }
  0xd5   : > { %1047 = vmatmul.msk.f32.gmra.mxu0 %vm386_vm0, %v379_v22  ;;  %v221_v22 = vld [vmem:[%s1314_s3 + $0x48] sm:$0xff] }
  0xd6   : > { %562 = vperm.xlu2 %1102, %v221_v22  }
  0xdd   : > { %1048 = vmatmul.msk.f32.gmra.mxu0 %vm386_vm0, %v375_v25  ;;  %v204_v25 = vld [vmem:[%s1313_s2 + $0x20] sm:$0xff] }
 0x131   : > { %v420_v26 = vpop.f32.mrf.mxu0 }
 0x132   : > { %v438_v28 = vmul.f32 0.95, %v420_v26  ;;  %v210_v26 = vld [vmem:[%s1313_s2 + $0x50] sm:$0xff] }
 0x134   : > { %v444_v29 = vadd.f32 %v438_v28, %v1168_v27  ;;  %v211_v28 = vld [vmem:[%s1313_s2 + $0x58] sm:$0xff] }
 0x136   : > { %1049 = vmatmul.msk.f32.vlgmr.msra.gmra.mxu1 %vm386_vm0, %v444_v29  ;;  %v518_v29 = vpop.permute.xlu1 %517 }
 0x13a   : > { %v423_v30 = vpop.f32.mrf.mxu0 }
 0x13b   : > { %v439_v32 = vmul.f32 0.95, %v423_v30 }
 0x13d   : > { %v445_v33 = vadd.f32 %v439_v32, %v1172_v31 }
 0x13e   : > { %v533_v30 = vpop.permute.xlu1 %532 }
 0x13f   : > { %1050 = vmatmul.msk.f32.gmra.mxu1 %vm386_vm0, %v445_v33 }
 0x142   : > { %v426_v34 = vpop.f32.mrf.mxu0 }
 0x143   : > { %v440_v36 = vmul.f32 0.95, %v426_v34 }
 0x145   : > { %v446_v37 = vadd.f32 %v440_v36, %v382_v35 }
 0x146   : > { %v538_v32 = vpop.permute.xlu1 %537 }
 0x147   : > { %1051 = vmatmul.msk.f32.gmra.mxu1 %vm386_vm0, %v446_v37 }
 0x14a   : > { %v429_v38 = vpop.f32.mrf.mxu0 }
 0x14b   : > { %v441_v40 = vmul.f32 0.95, %v429_v38 }
 0x14d   : > { %v447_v41 = vadd.f32 %v441_v40, %v383_v39 }
 0x14e   : > { %v548_v34 = vpop.permute.xlu1 %547 }
 0x14f   : > { %1052 = vmatmul.msk.f32.gmra.mxu1 %vm386_vm0, %v447_v41 }
 0x152   : > { %v432_v42 = vpop.f32.mrf.mxu0 }
 0x153   : > { %v442_v44 = vmul.f32 0.95, %v432_v42 }
 0x155   : > { %v448_v45 = vadd.f32 %v442_v44, %v384_v43  ;;  %v528_v44 = vpop.permute.xlu0 %527 }
 0x157   : > { %1053 = vmatmul.msk.f32.gmra.mxu1 %vm386_vm0, %v448_v45 }
 0x15a   : > { %v435_v46 = vpop.f32.mrf.mxu0 }
 0x15b   : > { %v443_v48 = vmul.f32 0.95, %v435_v46 }
 0x15d   : > { %v449_v49 = vadd.f32 %v443_v48, %v385_v47 }
 0x15f   : > { %1054 = vmatmul.msk.f32.gmra.mxu1 %vm386_vm0, %v449_v49 }
 0x1b3   : > { %v485_v52 = vpop.f32.mrf.mxu1 }
 0x1b4   : > { %v503_v8 = vmul.f32 0.95, %v485_v52 }
 0x1b6   : > { %v509_v11 = vadd.f32 %v503_v8, %v1168_v27  ;;  %v205_v27 = vld [vmem:[%s1313_s2 + $0x28] sm:$0xff] }
 0x1bc   : > { %v488_v54 = vpop.f32.mrf.mxu1 }
 0x1bd   : > { %v504_v5 = vmul.f32 0.95, %v488_v54  ;;  %v558_v54 = vpop.permute.xlu1 %557 }
 0x1bf   : > { %v510_v10 = vadd.f32 %v504_v5, %v1172_v31  ;;  %v523_v31 = vpop.permute.xlu2 %522 }
 0x1c4   : > { %v491_v57 = vpop.f32.mrf.mxu1 }
 0x1c5   : > { %v505_v3 = vmul.f32 0.95, %v491_v57 }
 0x1c7   : > { %v511_v9 = vadd.f32 %v505_v3, %v382_v35  ;;  %v543_v33 = vpop.permute.xlu2 %542 }
 0x1cc   : > { %v494_v58 = vpop.f32.mrf.mxu1 }
 0x1cd   : > { %v506_v1 = vmul.f32 0.95, %v494_v58 }
 0x1cf   : > { %v512_v6 = vadd.f32 %v506_v1, %v383_v39  ;;  %v553_v39 = vpop.permute.xlu2 %552 }
 0x1d4   : > { %v497_v60 = vpop.f32.mrf.mxu1 }
 0x1d5   : > { %v507_v63 = vmul.f32 0.95, %v497_v60 }
 0x1d7   : > { %v513_v4 = vadd.f32 %v507_v63, %v384_v43  ;;  %v573_v63 = vpop.permute.xlu0 %572 }
 0x1dc   : > { %v500_v62 = vpop.f32.mrf.mxu1 }
 0x1dd   : > { %v508_v0 = vmul.f32 0.95, %v500_v62  ;;  %v568_v62 = vpop.permute.xlu1 %567 }
 0x1df   : > { %v514_v2 = vadd.f32 %v508_v0, %v385_v47 }
 0x1e1   : > { %622 = vmatpush.msra.mxu2 %v514_v2  ;;  %1085 = vmatpush.msra.mxu3 %v514_v2 }
 0x1e3   : > { %623 = vmatpush.msra.mxu2 %v513_v4  ;;  %1086 = vmatpush.msra.mxu3 %v513_v4 }
 0x1e5   : > { %624 = vmatpush.msra.mxu2 %v512_v6  ;;  %1087 = vmatpush.msra.mxu3 %v512_v6 }
 0x1e7   : > { %625 = vmatpush.msra.mxu2 %v511_v9  ;;  %1088 = vmatpush.msra.mxu3 %v511_v9 }
 0x1e9   : > { %626 = vmatpush.msra.mxu2 %v510_v10  ;;  %1089 = vmatpush.msra.mxu3 %v510_v10 }
 0x1eb   : > { %627 = vmatpush.msra.mxu2 %v509_v11  ;;  %1090 = vmatpush.msra.mxu3 %v509_v11  ;;  %v563_v11 = vpop.permute.xlu2 %562 }
 0x1ec   : > { %1055 = vmatmul.msk.f32.vlgmr.msra.gmra.mxu2 %vm575_vm2, %v200_v12  ;;  %1061 = vmatmul.msk.f32.vlgmr.msra.gmra.mxu3 %vm575_vm2, %v206_v13 }
 0x1f4   : > { %1056 = vmatmul.msk.f32.gmra.mxu2 %vm575_vm2, %v201_v16  ;;  %1062 = vmatmul.msk.f32.gmra.mxu3 %vm575_vm2, %v207_v17 }
 0x1fc   : > { %1057 = vmatmul.msk.f32.gmra.mxu2 %vm575_vm2, %v202_v20  ;;  %1063 = vmatmul.msk.f32.gmra.mxu3 %vm575_vm2, %v208_v21 }
 0x204   : > { %1058 = vmatmul.msk.f32.gmra.mxu2 %vm575_vm2, %v203_v23  ;;  %1064 = vmatmul.msk.f32.gmra.mxu3 %vm575_vm2, %v209_v24 }
 0x20c   : > { %1059 = vmatmul.msk.f32.gmra.mxu2 %vm575_vm2, %v204_v25  ;;  %1065 = vmatmul.msk.f32.gmra.mxu3 %vm575_vm2, %v210_v26 }
 0x214   : > { %1060 = vmatmul.msk.f32.gmra.mxu2 %vm575_vm2, %v205_v27  ;;  %1066 = vmatmul.msk.f32.gmra.mxu3 %vm575_vm2, %v211_v28 }
 0x26f   : > { %v629_v35 = vpop.f32.mrf.mxu2  ;;  %v647_v36 = vpop.f32.mrf.mxu3 }
 0x270   : > { %v630_v37 = vadd.f32 %v629_v35, %v518_v29  ;;  %v648_v38 = vadd.f32 %v647_v36, %v548_v34 }
 0x272   : > { %819 = vxpose.xlu0.b32.start [1/2] (short) (narrow) %v648_v38, 16  ;;  %665 = vxpose.xlu2.b32.start [1/2] (short) (narrow) %v630_v37, 16 }
 0x277   : > { %v632_v40 = vpop.f32.mrf.mxu2  ;;  %v650_v41 = vpop.f32.mrf.mxu3 }
 0x278   : > { %v633_v42 = vadd.f32 %v632_v40, %v523_v31  ;;  %v651_v43 = vadd.f32 %v650_v41, %v553_v39 }
 0x27a   : > { %820 = vxpose.xlu0.b32.end [2/2] (short) (narrow) %v651_v43, 16  ;;  %666 = vxpose.xlu2.b32.end [2/2] (short) (narrow) %v633_v42, 16  ;;  %v702_v48 = vrot.slane %v633_v42, 4  ;;  %v856_v60 = vrot.slane %v651_v43, 4 }
 0x27f   : > { %v635_v45 = vpop.f32.mrf.mxu2  ;;  %v653_v46 = vpop.f32.mrf.mxu3 }
 0x280   : > { %v636_v47 = vadd.f32 %v635_v45, %v528_v44  ;;  %v654_v55 = vadd.f32 %v653_v46, %v558_v54 }
 0x282   : > { %v703_v49 = vrot.slane %v636_v47, 4  ;;  %v857_v58 = vrot.slane %v654_v55, 4 }
 0x284   : > { %v704_v50 = vsel %vm365_vm1, %v702_v48, %v703_v49  ;;  %v858_v61 = vsel %vm365_vm1, %v856_v60, %v857_v58 }
 0x285   : > { %707 = vxpose.xlu1.b32.start [1/2] (short) (narrow) %v704_v50, 16 }
 0x287   : > { %v638_v51 = vpop.f32.mrf.mxu2  ;;  %v656_v52 = vpop.f32.mrf.mxu3 }
 0x288   : > { %v639_v53 = vadd.f32 %v638_v51, %v533_v30  ;;  %v657_v12 = vadd.f32 %v656_v52, %v563_v11 }
 0x28a   : > { %742 = vxpose.xlu0.b32.start [1/2] (short) (narrow) %v639_v53, 16 }
 0x28d   : > { %708 = vxpose.xlu1.b32.end [2/2] (short) (narrow) %v703_v49, 16 }
 0x28f   : > { %v641_v56 = vpop.f32.mrf.mxu2  ;;  %v659_v57 = vpop.f32.mrf.mxu3 }
 0x290   : > { %v642_v59 = vadd.f32 %v641_v56, %v538_v32  ;;  %v660_v0 = vadd.f32 %v659_v57, %v568_v62 }
 0x292   : > { %743 = vxpose.xlu0.b32.end [2/2] (short) (narrow) %v642_v59, 16  ;;  %v779_v5 = vrot.slane %v642_v59, 4  ;;  %v933_v6 = vrot.slane %v660_v0, 4 }
 0x295   : > { %861 = vxpose.xlu1.b32.start [1/2] (short) (narrow) %v858_v61, 16 }
 0x297   : > { %v644_v1 = vpop.f32.mrf.mxu2  ;;  %v662_v2 = vpop.f32.mrf.mxu3 }
 0x298   : > { %v645_v3 = vadd.f32 %v644_v1, %v543_v33  ;;  %v663_v4 = vadd.f32 %v662_v2, %v573_v63 }
 0x29a   : > { %v780_v7 = vrot.slane %v645_v3, 4  ;;  %v934_v8 = vrot.slane %v663_v4, 4 }
 0x29c   : > { %v781_v9 = vsel %vm365_vm1, %v779_v5, %v780_v7  ;;  %v935_v10 = vsel %vm365_vm1, %v933_v6, %v934_v8 }
 0x29d   : > { %784 = vxpose.xlu2.b32.start [1/2] (short) (narrow) %v781_v9, 16  ;;  %862 = vxpose.xlu1.b32.end [2/2] (short) (narrow) %v857_v58, 16 }
 0x29e   : > { %938 = vxpose.xlu0.b32.start [1/2] (short) (narrow) %v935_v10, 16 }
 0x2a5   : > { %785 = vxpose.xlu2.b32.end [2/2] (short) (narrow) %v780_v7, 16 }
 0x2a6   : > { %939 = vxpose.xlu0.b32.end [2/2] (short) (narrow) %v934_v8, 16 }
 0x2ad   : > { %896 = vxpose.xlu2.b32.start [1/2] (short) (narrow) %v657_v12, 16 }
 0x2b5   : > { %897 = vxpose.xlu2.b32.end [2/2] (short) (narrow) %v660_v0, 16 }
 0x30b   : > { %v681_v13 = vpop.trf.xlu2 }
 0x30c   : > { %698 = vst.msk [vmem:[%s1274_s28] sm:$0xff] %vm697_vm3, %v681_v13 }
 0x313   : > { %v682_v14 = vpop.trf.xlu2 }
 0x314   : > { %699 = vst.msk [vmem:[%s1274_s28 + $0x8] sm:$0xff] %vm697_vm3, %v682_v14 }
 0x316   : > { %v835_v15 = vpop.trf.xlu0 }
 0x317   : > { %1073 = vst.msk [vmem:[%s1274_s28 + $0x40] sm:$0xff] %vm697_vm3, %v835_v15 }
 0x31e   : > { %v836_v16 = vpop.trf.xlu0 }
 0x31f   : > { %1074 = vst.msk [vmem:[%s1274_s28 + $0x48] sm:$0xff] %vm697_vm3, %v836_v16 }
 0x329   : > { %v723_v17 = vpop.trf.xlu1 }
 0x32a   : > { %1067 = vst.msk [vmem:[%s1274_s28 + $0x10] sm:$0xff] %vm697_vm3, %v723_v17 }
 0x32e   : > { %v758_v18 = vpop.trf.xlu0 }
 0x32f   : > { %1069 = vst.msk [vmem:[%s1274_s28 + $0x20] sm:$0xff] %vm697_vm3, %v758_v18 }
 0x331   : > { %v724_v19 = vpop.trf.xlu1 }
 0x332   : > { %1068 = vst.msk [vmem:[%s1274_s28 + $0x18] sm:$0xff] %vm697_vm3, %v724_v19 }
 0x336   : > { %v800_v20 = vpop.trf.xlu2  ;;  %v759_v21 = vpop.trf.xlu0 }
 0x337   : > { %1071 = vst.msk [vmem:[%s1274_s28 + $0x30] sm:$0xff] %vm697_vm3, %v800_v20 }
 0x338   : > { %1070 = vst.msk [vmem:[%s1274_s28 + $0x28] sm:$0xff] %vm697_vm3, %v759_v21 }
 0x339   : > { %v877_v22 = vpop.trf.xlu1 }
 0x33a   : > { %1075 = vst.msk [vmem:[%s1274_s28 + $0x50] sm:$0xff] %vm697_vm3, %v877_v22 }
 0x33e   : > { %v801_v23 = vpop.trf.xlu2 }
 0x33f   : > { %1072 = vst.msk [vmem:[%s1274_s28 + $0x38] sm:$0xff] %vm697_vm3, %v801_v23 }
 0x341   : > { %v878_v24 = vpop.trf.xlu1 }
 0x342   : > { %v954_v25 = vpop.trf.xlu0  ;;  %1076 = vst.msk [vmem:[%s1274_s28 + $0x58] sm:$0xff] %vm697_vm3, %v878_v24 }
 0x343   : > { %1079 = vst.msk [vmem:[%s1274_s28 + $0x70] sm:$0xff] %vm697_vm3, %v954_v25 }
 0x346   : > { %v912_v26 = vpop.trf.xlu2 }
 0x347   : > { %1077 = vst.msk [vmem:[%s1274_s28 + $0x60] sm:$0xff] %vm697_vm3, %v912_v26 }
 0x34a   : > { %v955_v27 = vpop.trf.xlu0 }
 0x34b   : > { %1080 = vst.msk [vmem:[%s1274_s28 + $0x78] sm:$0xff] %vm697_vm3, %v955_v27 }
 0x34e   : > { %v913_v28 = vpop.trf.xlu2 }
 0x34f   : > { %1078 = vst.msk [vmem:[%s1274_s28 + $0x68] sm:$0xff] %vm697_vm3, %v913_v28 }
 0x350 PF: > { %s14_s15 = sadd.s32 1, %s1110_s15  }
 0x351   : > { %p11_p4 = scmp.ge.s32.totalorder %s14_s15, 4  }
 0x353   :  { %13 = sbr.rel (!%p11_p4) target bundleno = 1 (0x1), region = 76 }

</bundles_post_ra>
